<compile_context>
chip_gen: v7x
topology: tpu7x:2x2x1
jax: 0.10.0
libtpu: 0.0.40
codegen_flags: <defaults>
</compile_context>

<pallas_src>
import functools

import numpy as np
import jax
import jax.numpy as jnp
from jax.experimental import pallas as pl
from jax.experimental.pallas import tpu as pltpu


def _round_up(x, m):
    return ((x + m - 1) // m) * m


def _cdiv(a, b):
    return -(-a // b)


# ---------------------------------------------------------------------------
# Kernels
# ---------------------------------------------------------------------------
def _mlp_kernel(x_ref, w1_ref, b1_ref, w2_ref, b2_ref, o_ref):
    """Fast path: W1/W2 VMEM-resident, 1-D grid over batch row tiles."""
    h = jnp.dot(x_ref[...], w1_ref[...], preferred_element_type=jnp.float32)
    h = jnp.tanh(h + b1_ref[...])                     # bias + tanh kept in f32 (VPU/EUP)
    # TODO(synk): nn.Dropout(0.8) is identity in eval mode; training-mode RNG drop not emitted.
    o = jnp.dot(h.astype(w2_ref.dtype), w2_ref[...], preferred_element_type=jnp.float32)
    o_ref[...] = (o + b2_ref[...]).astype(o_ref.dtype)


def _mlp_kernel_htiled(x_ref, w1_ref, b1_ref, w2_ref, b2_ref, o_ref, acc_ref):
    """Fallback: grid = (batch tiles, hidden tiles); accumulate second matmul over H chunks.

    Valid because tanh is elementwise over the hidden dim:
        out = sum_j tanh(x @ W1[:, j] + b1[j]) @ W2[j, :]  + b2
    """
    j = pl.program_id(1)

    @pl.when(j == 0)
    def _():
        acc_ref[...] = jnp.zeros_like(acc_ref)

    h = jnp.dot(x_ref[...], w1_ref[...], preferred_element_type=jnp.float32)
    h = jnp.tanh(h + b1_ref[...])
    acc_ref[...] += jnp.dot(h.astype(w2_ref.dtype), w2_ref[...],
                            preferred_element_type=jnp.float32)

    @pl.when(j == pl.num_programs(1) - 1)
    def _():
        o_ref[...] = (acc_ref[...] + b2_ref[...]).astype(o_ref.dtype)


# ---------------------------------------------------------------------------
# VMEM budgeting
# ---------------------------------------------------------------------------
@functools.lru_cache(maxsize=1)
def _vmem_budget():
    """(usable budget for tiling math, vmem_limit_bytes) per TPU generation."""
    cap = 128 << 20
    try:
        info = pltpu.get_tpu_info()
        cap = int(getattr(info, "vmem_capacity_bytes", cap))
    except Exception:
        pass
    if cap >= (100 << 20):            # v5e / v6e: 128 MiB physical VMEM
        return 80 << 20, 100 << 20
    return 24 << 20, 32 << 20         # v7x: 64 MiB per TensorCore


def _pick_block_rows(batch, d_in, d_out, d_hide, *, wt_bytes, out_bytes,
                     vmem_budget, max_rows=1024, min_tiles=4):
    """Row tile for the fast (weights-resident) path; 0 => use the H-tiled fallback."""
    # Constant-index weight/bias blocks are still double-buffered by default -> x2.
    resident = 2 * (d_in * d_hide * wt_bytes + d_hide * d_out * wt_bytes
                    + (d_hide + d_out) * 4)
    # Double-buffered bf16 x rows + double-buffered out rows + the in-kernel h
    # intermediate (f32) and its bf16 cast for the second matmul (~6 B per hidden elem).
    per_row = 2 * (d_in * 2) + 2 * (d_out * out_bytes) + 6 * d_hide
    avail = vmem_budget - resident
    if avail < 16 * per_row:
        return 0                      # resident weights don't fit -> H-tiled fallback
    tb = min(max_rows, avail // per_row)
    # Keep >= min_tiles batch tiles when the batch allows it so the "parallel" axis
    # can actually be sharded across v7x's two TensorCores.
    tb = min(tb, max(16, _round_up(_cdiv(batch, min_tiles), 16)))
    tb = max(16, (tb // 16) * 16)     # multiple of 16: bf16 sublane packing
    return int(tb)


def _pick_h_tiles(batch, d_in, d_out, d_hide, *, wt_bytes, out_bytes,
                  vmem_budget, max_h_tile=None):
    """(row tile, hidden tile) for the H-tiled fallback path."""
    tb = max(16, min(128, _round_up(batch, 16)))
    avail, per_th = 0, 1
    while True:
        fixed = (2 * tb * d_in * 2                # x tile, double-buffered bf16
                 + 2 * d_out * 4                  # b2 (double-buffered f32)
                 + 2 * tb * d_out * out_bytes     # out tile, double-buffered
                 + tb * d_out * 4)                # f32 accumulator scratch
        per_th = 2 * (d_in * wt_bytes + 4 + d_out * wt_bytes) + 6 * tb
        avail = vmem_budget - fixed
        if avail >= 128 * per_th or tb == 16:
            break
        tb = max(16, tb // 2)
    th = max(128, (avail // per_th) // 128 * 128)
    th = min(th, d_hide)
    if max_h_tile is not None:
        th = min(th, max_h_tile)
    while d_hide % th != 0:           # grid needs th | padded hidden dim; 128 always divides
        th -= 128
    # TODO(synk): no K-tiling over size_in; an extremely large input dim would need that too.
    return int(tb), int(th)


# ---------------------------------------------------------------------------
# Parameter preparation (run ONCE per model, not per inference call)
# ---------------------------------------------------------------------------
def prepare_params(params, eps=1e-5, weight_dtype=jnp.bfloat16):
    """Fold BatchNorm into linear_1, zero-pad feature dims to 128 lanes, cast weights."""
    w1, b1 = params["w1"], params["b1"]
    gamma, beta = params["gamma"], params["beta"]
    rmean, rvar = params["running_mean"], params["running_var"]
    w2, b2 = params["w2"], params["b2"]

    size_in, size_hide = w1.shape
    size_out = w2.shape[1]

    scale = gamma * jax.lax.rsqrt(rvar + eps)               # [H]
    w1_f = w1 * scale[None, :]                              # [IN, H]
    b1_f = b1 * scale + (beta - rmean * scale)              # [H]

    IN = _round_up(size_in, 128)
    H = _round_up(size_hide, 128)
    O = _round_up(size_out, 128)

    # TODO(synk): on v7x an fp8 weight cast would halve resident VMEM / raise MXU rate.
    w1_p = jnp.zeros((IN, H), jnp.float32).at[:size_in, :size_hide].set(w1_f).astype(weight_dtype)
    b1_p = jnp.zeros((1, H), jnp.float32).at[0, :size_hide].set(b1_f)
    w2_p = jnp.zeros((H, O), jnp.float32).at[:size_hide, :size_out].set(w2).astype(weight_dtype)
    b2_p = jnp.zeros((1, O), jnp.float32).at[0, :size_out].set(b2)

    return {
        "w1_p": w1_p, "b1_p": b1_p, "w2_p": w2_p, "b2_p": b2_p,
        "size_in": size_in, "size_hide": size_hide, "size_out": size_out,
    }


# ---------------------------------------------------------------------------
# Forward
# ---------------------------------------------------------------------------
def my_model_forward(x, prepared, *, out_dtype=jnp.float32,
                     force_h_tiling=False, max_h_tile=None):
    """x: [B, size_in] -> [B, size_out] (eval-mode forward, dropout = identity)."""
    w1_p, b1_p = prepared["w1_p"], prepared["b1_p"]
    w2_p, b2_p = prepared["w2_p"], prepared["b2_p"]
    size_in, size_out = prepared["size_in"], prepared["size_out"]

    B, xi = x.shape
    assert xi == size_in, f"x feature dim {xi} != model size_in {size_in}"

    IN, H = w1_p.shape
    O = w2_p.shape[1]
    wt_bytes = w1_p.dtype.itemsize
    out_bytes = np.dtype(out_dtype).itemsize

    vmem_budget, vmem_limit = _vmem_budget()

    TB = 0 if force_h_tiling else _pick_block_rows(
        B, IN, O, H, wt_bytes=wt_bytes, out_bytes=out_bytes, vmem_budget=vmem_budget)
    use_fast = TB > 0
    if not use_fast:
        TB, TH = _pick_h_tiles(B, IN, O, H, wt_bytes=wt_bytes, out_bytes=out_bytes,
                               vmem_budget=vmem_budget, max_h_tile=max_h_tile)

    Bp = _round_up(B, TB)

    # Cast to bf16 first, then pad (single wrapper-side HBM pass); skip when not needed.
    x_bf = x.astype(jnp.bfloat16)
    if (Bp, IN) != (B, size_in):
        x_bf = jnp.zeros((Bp, IN), jnp.bfloat16).at[:B, :size_in].set(x_bf)

    if use_fast:
        out = pl.pallas_call(
            _mlp_kernel,
            out_shape=jax.ShapeDtypeStruct((Bp, O), out_dtype),
            grid=(Bp // TB,),
            in_specs=[
                pl.BlockSpec((TB, IN), lambda i: (i, 0)),   # x row tile (pipelined)
                pl.BlockSpec((IN, H), lambda i: (0, 0)),    # W1 (BN-folded), VMEM-resident
                pl.BlockSpec((1, H), lambda i: (0, 0)),     # folded bias (f32)
                pl.BlockSpec((H, O), lambda i: (0, 0)),     # W2, VMEM-resident
                pl.BlockSpec((1, O), lambda i: (0, 0)),     # b2 (f32)
            ],
            out_specs=pl.BlockSpec((TB, O), lambda i: (i, 0)),
            compiler_params=pltpu.CompilerParams(
                dimension_semantics=("parallel",),
                vmem_limit_bytes=vmem_limit,
            ),
        )(x_bf, w1_p, b1_p, w2_p, b2_p)
    else:
        out = pl.pallas_call(
            _mlp_kernel_htiled,
            out_shape=jax.ShapeDtypeStruct((Bp, O), out_dtype),
            grid=(Bp // TB, H // TH),
            in_specs=[
                pl.BlockSpec((TB, IN), lambda i, j: (i, 0)),  # x row tile
                pl.BlockSpec((IN, TH), lambda i, j: (0, j)),  # W1 column chunk
                pl.BlockSpec((1, TH), lambda i, j: (0, j)),   # folded bias chunk
                pl.BlockSpec((TH, O), lambda i, j: (j, 0)),   # W2 row chunk
                pl.BlockSpec((1, O), lambda i, j: (0, 0)),    # b2
            ],
            out_specs=pl.BlockSpec((TB, O), lambda i, j: (i, 0)),
            scratch_shapes=[pltpu.VMEM((TB, O), jnp.float32)],
            compiler_params=pltpu.CompilerParams(
                dimension_semantics=("parallel", "arbitrary"),
                vmem_limit_bytes=vmem_limit,
            ),
        )(x_bf, w1_p, b1_p, w2_p, b2_p)

    if (Bp, O) == (B, size_out):
        return out
    return out[:B, :size_out]


# ---------------------------------------------------------------------------
# Reference / test harness
# ---------------------------------------------------------------------------
def init_params(key, size_in, size_hide, size_out):
    k1, k2, k3, k4, k5, k6 = jax.random.split(key, 6)
    lim1 = 1.0 / (size_in ** 0.5)
    lim2 = 1.0 / (size_hide ** 0.5)
    return {
        "w1": jax.random.uniform(k1, (size_in, size_hide), jnp.float32, -lim1, lim1),
        "b1": jax.random.uniform(k2, (size_hide,), jnp.float32, -lim1, lim1),
        "gamma": jnp.ones((size_hide,), jnp.float32),
        "beta": jnp.zeros((size_hide,), jnp.float32),
        "running_mean": 0.1 * jax.random.normal(k3, (size_hide,), jnp.float32),
        "running_var": 1.0 + 0.05 * jax.random.uniform(k4, (size_hide,), jnp.float32),
        "w2": jax.random.uniform(k5, (size_hide, size_out), jnp.float32, -lim2, lim2),
        "b2": jax.random.uniform(k6, (size_out,), jnp.float32, -lim2, lim2),
    }


def _reference_f32(x, params, eps=1e-5):
    h = x.astype(jnp.float32) @ params["w1"] + params["b1"]
    h = (h - params["running_mean"]) * jax.lax.rsqrt(params["running_var"] + eps)
    h = h * params["gamma"] + params["beta"]
    h = jnp.tanh(h)
    return h @ params["w2"] + params["b2"]


if __name__ == "__main__":
    key = jax.random.PRNGKey(0)
    kx, kp, kx2, kp2 = jax.random.split(key, 4)

    # --- Test 1: fast path (weights VMEM-resident, 1-D batch grid) ---
    B, size_in, size_hide, size_out = 8, 32, 64, 16
    x = jax.random.normal(kx, (B, size_in), jnp.float32)
    params = init_params(kp, size_in, size_hide, size_out)
    prepared = prepare_params(params)                      # one-time weight prep
    out = jax.block_until_ready(my_model_forward(x, prepared))
    ref = _reference_f32(x, params)
    assert out.shape == (B, size_out)
    assert jnp.allclose(out, ref, atol=5e-2, rtol=5e-2), "fast-path mismatch vs reference"

    # --- Test 2: H-tiled fallback path (accumulator over hidden-dim chunks) ---
    B2, in2, hid2, out2 = 24, 48, 300, 16
    x2 = jax.random.normal(kx2, (B2, in2), jnp.float32)
    params2 = init_params(kp2, in2, hid2, out2)
    prepared2 = prepare_params(params2)
    o2 = jax.block_until_ready(
        my_model_forward(x2, prepared2, force_h_tiling=True, max_h_tile=128))
    r2 = _reference_f32(x2, params2)
    assert o2.shape == (B2, out2)
    assert jnp.allclose(o2, r2, atol=5e-2, rtol=5e-2), "H-tiled path mismatch vs reference"

    print("KERNEL_OK")
</pallas_src>

<mosaic_0001>
module attributes {stable_mosaic.version = 11 : i64} {
  func.func @_mlp_kernel(%arg0: i32, %arg1: memref<16x128xbf16, #tpu.memory_space<vmem>>, %arg2: memref<128x128xbf16, #tpu.memory_space<vmem>>, %arg3: memref<1x128xf32, #tpu.memory_space<vmem>>, %arg4: memref<128x128xbf16, #tpu.memory_space<vmem>>, %arg5: memref<1x128xf32, #tpu.memory_space<vmem>>, %arg6: memref<16x128xf32, #tpu.memory_space<vmem>>) attributes {dimension_semantics = [#tpu.dimension_semantics<parallel>], iteration_bounds = array<i64: 1>, scalar_prefetch = 0 : i64, scratch_operands = 0 : i64, tpu.core_type = #tpu.core_type<tc>, window_params = [{transform_indices = @transform_0, window_bounds = array<i64: 16, 128>}, {pipeline_mode = #tpu.pipeline_mode<synchronous>, transform_indices = @transform_1, window_bounds = array<i64: 128, 128>}, {pipeline_mode = #tpu.pipeline_mode<synchronous>, transform_indices = @transform_2, window_bounds = array<i64: 1, 128>}, {pipeline_mode = #tpu.pipeline_mode<synchronous>, transform_indices = @transform_3, window_bounds = array<i64: 128, 128>}, {pipeline_mode = #tpu.pipeline_mode<synchronous>, transform_indices = @transform_4, window_bounds = array<i64: 1, 128>}, {transform_indices = @transform_5, window_bounds = array<i64: 16, 128>}]} {
    %c0 = arith.constant 0 : index
    %c0_0 = arith.constant 0 : index
    %0 = vector.load %arg1[%c0, %c0_0] : memref<16x128xbf16, #tpu.memory_space<vmem>>, vector<16x128xbf16>
    %c0_1 = arith.constant 0 : index
    %c0_2 = arith.constant 0 : index
    %1 = vector.load %arg2[%c0_1, %c0_2] : memref<128x128xbf16, #tpu.memory_space<vmem>>, vector<128x128xbf16>
    %cst = arith.constant dense<0.000000e+00> : vector<16x128xf32>
    %2 = tpu.matmul %0, %1, %cst {dimension_numbers = #tpu.dot_dimension_numbers<[1], [0], [0], [1], [0, 0, 1, 1], [], []>} : vector<16x128xbf16>, vector<128x128xbf16>, vector<16x128xf32> -> vector<16x128xf32>
    %c0_3 = arith.constant 0 : index
    %c0_4 = arith.constant 0 : index
    %3 = vector.load %arg3[%c0_3, %c0_4] : memref<1x128xf32, #tpu.memory_space<vmem>>, vector<1x128xf32>
    %4 = vector.broadcast %3 : vector<1x128xf32> to vector<16x128xf32>
    %5 = arith.addf %2, %4 : vector<16x128xf32>
    %6 = math.tanh %5 : vector<16x128xf32>
    %7 = arith.truncf %6 : vector<16x128xf32> to vector<16x128xbf16>
    %c0_5 = arith.constant 0 : index
    %c0_6 = arith.constant 0 : index
    %8 = vector.load %arg4[%c0_5, %c0_6] : memref<128x128xbf16, #tpu.memory_space<vmem>>, vector<128x128xbf16>
    %cst_7 = arith.constant dense<0.000000e+00> : vector<16x128xf32>
    %9 = tpu.matmul %7, %8, %cst_7 {dimension_numbers = #tpu.dot_dimension_numbers<[1], [0], [0], [1], [0, 0, 1, 1], [], []>} : vector<16x128xbf16>, vector<128x128xbf16>, vector<16x128xf32> -> vector<16x128xf32>
    %c0_8 = arith.constant 0 : index
    %c0_9 = arith.constant 0 : index
    %10 = vector.load %arg5[%c0_8, %c0_9] : memref<1x128xf32, #tpu.memory_space<vmem>>, vector<1x128xf32>
    %11 = vector.broadcast %10 : vector<1x128xf32> to vector<16x128xf32>
    %12 = arith.addf %9, %11 : vector<16x128xf32>
    %c0_10 = arith.constant 0 : index
    %c0_11 = arith.constant 0 : index
    %13 = vector.load %arg6[%c0_10, %c0_11] : memref<16x128xf32, #tpu.memory_space<vmem>>, vector<16x128xf32>
    tpu.vector_store %arg6[%c0_10, %c0_11], %12 {strides = array<i32>} : memref<16x128xf32, #tpu.memory_space<vmem>>, vector<16x128xf32>,
    return
  }
  func.func @transform_0(%arg0: i32) -> (i32, i32) {
    %c0_i32 = arith.constant 0 : i32
    %c0_i32_0 = arith.constant 0 : i32
    return %arg0, %c0_i32 : i32, i32
  }
  func.func @transform_1(%arg0: i32) -> (i32, i32) {
    %c0_i32 = arith.constant 0 : i32
    %c0_i32_0 = arith.constant 0 : i32
    %c0_i32_1 = arith.constant 0 : i32
    return %c0_i32, %c0_i32_0 : i32, i32
  }
  func.func @transform_2(%arg0: i32) -> (i32, i32) {
    %c0_i32 = arith.constant 0 : i32
    %c0_i32_0 = arith.constant 0 : i32
    %c0_i32_1 = arith.constant 0 : i32
    return %c0_i32, %c0_i32_0 : i32, i32
  }
  func.func @transform_3(%arg0: i32) -> (i32, i32) {
    %c0_i32 = arith.constant 0 : i32
    %c0_i32_0 = arith.constant 0 : i32
    %c0_i32_1 = arith.constant 0 : i32
    return %c0_i32, %c0_i32_0 : i32, i32
  }
  func.func @transform_4(%arg0: i32) -> (i32, i32) {
    %c0_i32 = arith.constant 0 : i32
    %c0_i32_0 = arith.constant 0 : i32
    %c0_i32_1 = arith.constant 0 : i32
    return %c0_i32, %c0_i32_0 : i32, i32
  }
  func.func @transform_5(%arg0: i32) -> (i32, i32) {
    %c0_i32 = arith.constant 0 : i32
    %c0_i32_0 = arith.constant 0 : i32
    return %arg0, %c0_i32 : i32, i32
  }
}

</mosaic_0001>

<bundles_post_ra>
// kernel: tpu_custom_call.1
= control target key start
LH: loop header
LB: loop body
LE: loop exit
PB: predicated region body
PF: predicated region fallthrough
CT: control target
= control target key end

     0   :  { %10 = vsyncpa [#allocation3], 0  ;;  %s722_s0 = inlined_call_operand.hbm [shape: bf16[16,128], index: 0, kind: input, shape index: {}]   ;;  %s723_s1 = inlined_call_operand.hbm [shape: bf16[128,128], index: 1, kind: input, shape index: {}]   ;;  %s724_s2 = inlined_call_operand.hbm [shape: f32[1,128], index: 2, kind: input, shape index: {}]   ;;  %s725_s3 = inlined_call_operand.hbm [shape: bf16[128,128], index: 3, kind: input, shape index: {}]   ;;  %s726_s4 = inlined_call_operand.hbm [shape: f32[1,128], index: 4, kind: input, shape index: {}]   ;;  %s727_s5 = inlined_call_operand.hbm [shape: f32[16,128], index: 5, kind: output, shape index: {}]  }
   0x1   :  { %11 = vsyncpa [#allocation6], 0 }
   0x2   :  { %12 = vsyncpa [#allocation9], 0 }
   0x3   :  { %13 = vsyncpa [#allocation4], 0  ;;  %s592_s18 = smov [#allocation5]   ;;  %s593_s20 = smov [#allocation8]  }
   0x4   :  { %s31_s19 = sshll.u32 %s592_s18, 4  ;;  %s53_s21 = sshll.u32 %s593_s20, 4  ;;  %s32_s19 = int_to_ptr.vmem [resolvable:$true] %s31_s19  ;;  %s634_s21 = int_to_ptr.vmem [resolvable:$true] %s53_s21 }
   0x5   :  { %s452_s24 = scalar_lea.hbm %s723_s1, 1024 }
   0x6   :  { %p453_p0 = scmp.ne.s32.totalorder %s723_s1, %s452_s24  ;;  %p456_p1 = scmp.lt.u32.totalorder %s452_s24, %s723_s1 }
   0x8   :  { %p458_p2 = pnand %p456_p1, %p453_p0 }
   0xa   :  { %461 = shalt.err (!%p458_p2)
}
   0xb   :  { %s462_s29 = scalar_lea.vmem %s32_s19, 1024  ;;  %p467_p4 = scmp.lt.s32.totalorder %s32_s19, %s32_s19 }
   0xc   :  { %p463_p3 = scmp.ne.s32.totalorder %s32_s19, %s462_s29  ;;  %p468_p5 = scmp.lt.s32.totalorder %s462_s29, %s462_s29 }
   0xe   :  { %p469_p6 = por %p468_p5, %p467_p4 }
  0x10   :  { %p470_p7 = pnand %p469_p6, %p463_p3 }
  0x12   :  { %473 = shalt.err (!%p470_p7)
}
  0x13   :  { %s594_s30 = smov 64   ;;  %s595_s6 = smov 4  }
  0x14   :  { %37 = dma.hbm_to_vmem [thread:$0]  %s723_s1, 1024, %s32_s19, [#allocation6], %s594_s30, %s594_s30, %s595_s6  }
  0x15   :  { %s474_s11 = scalar_lea.hbm %s725_s3, 1024 }
  0x16   :  { %p475_p8 = scmp.ne.s32.totalorder %s725_s3, %s474_s11  ;;  %p478_p9 = scmp.lt.u32.totalorder %s474_s11, %s725_s3 }
  0x18   :  { %p480_p10 = pnand %p478_p9, %p475_p8 }
  0x1a   :  { %483 = shalt.err (!%p480_p10)
}
  0x1b   :  { %s484_s16 = scalar_lea.vmem %s634_s21, 1024  ;;  %p489_p12 = scmp.lt.s32.totalorder %s634_s21, %s634_s21 }
  0x1c   :  { %p485_p11 = scmp.ne.s32.totalorder %s634_s21, %s484_s16  ;;  %p490_p13 = scmp.lt.s32.totalorder %s484_s16, %s484_s16 }
  0x1e   :  { %p491_p0 = por %p490_p13, %p489_p12 }
  0x20   :  { %p492_p1 = pnand %p491_p0, %p485_p11 }
  0x22   :  { %495 = shalt.err (!%p492_p1)
}
  0x23   :  { %59 = dma.hbm_to_vmem [thread:$0]  %s725_s3, 1024, %s634_s21, [#allocation9], %s594_s30, %s594_s30, %s595_s6  }
  0x24   :  { %s596_s18 = smov [#allocation2]   ;;  %s597_s20 = smov [#allocation7]  }
  0x25   :  { %s19_s19 = sshll.u32 %s596_s18, 4  ;;  %s44_s22 = sshll.u32 %s597_s20, 4  ;;  %s20_s19 = int_to_ptr.vmem [resolvable:$true] %s19_s19  ;;  %s45_s22 = int_to_ptr.vmem [resolvable:$true] %s44_s22 }
  0x26   :  { %s496_s25 = scalar_lea.hbm %s722_s0, 128 }
  0x27   :  { %p497_p2 = scmp.ne.s32.totalorder %s722_s0, %s496_s25  ;;  %p500_p3 = scmp.lt.u32.totalorder %s496_s25, %s722_s0 }
  0x29   :  { %p502_p4 = pnand %p500_p3, %p497_p2 }
  0x2b   :  { %505 = shalt.err (!%p502_p4)
}
  0x2c   :  { %s506_s3 = scalar_lea.vmem %s20_s19, 128  ;;  %p511_p6 = scmp.lt.s32.totalorder %s20_s19, %s20_s19 }
  0x2d   :  { %p507_p5 = scmp.ne.s32.totalorder %s20_s19, %s506_s3  ;;  %p512_p7 = scmp.lt.s32.totalorder %s506_s3, %s506_s3 }
  0x2f   :  { %p513_p8 = por %p512_p7, %p511_p6 }
  0x31   :  { %p514_p9 = pnand %p513_p8, %p507_p5 }
  0x33   :  { %517 = shalt.err (!%p514_p9)
}
  0x34   :  { %25 = dma.hbm_to_vmem [thread:$0]  %s722_s0, 128, %s20_s19, [#allocation3], %s594_s30, %s594_s30, %s595_s6  }
  0x35   :  { %s518_s10 = scalar_lea.hbm %s724_s2, 16 }
  0x36   :  { %p519_p10 = scmp.ne.s32.totalorder %s724_s2, %s518_s10  ;;  %p522_p11 = scmp.lt.u32.totalorder %s518_s10, %s724_s2 }
  0x38   :  { %p524_p12 = pnand %p522_p11, %p519_p10 }
  0x3a   :  { %527 = shalt.err (!%p524_p12)
}
  0x3b   :  { %s528_s15 = scalar_lea.vmem %s45_s22, 16  ;;  %s532_s16 = scalar_lea.vmem %s45_s22, 32 }
  0x3c   :  { %p529_p13 = scmp.ne.s32.totalorder %s45_s22, %s528_s15  ;;  %p533_p0 = scmp.lt.s32.totalorder %s45_s22, %s45_s22 }
  0x3d   :  { %p534_p1 = scmp.lt.s32.totalorder %s532_s16, %s528_s15 }
  0x3f   :  { %p535_p2 = por %p534_p1, %p533_p0 }
  0x41   :  { %p536_p3 = pnand %p535_p2, %p529_p13 }
  0x43   :  { %539 = shalt.err (!%p536_p3)
}
  0x44   :  { %47 = dma.hbm_to_vmem [thread:$0]  %s724_s2, 16, %s45_s22, [#allocation6]  }
  0x45   :  { %s598_s6 = smov [#allocation10]   ;;  %s540_s19 = scalar_lea.hbm %s726_s4, 16 }
  0x46   :  { %s66_s1 = sshll.u32 %s598_s6, 4  ;;  %p541_p4 = scmp.ne.s32.totalorder %s726_s4, %s540_s19  ;;  %s67_s1 = int_to_ptr.vmem [resolvable:$true] %s66_s1 }
  0x47   :  { %p544_p5 = scmp.lt.u32.totalorder %s540_s19, %s726_s4 }
  0x49   :  { %p546_p6 = pnand %p544_p5, %p541_p4 }
  0x4b   :  { %549 = shalt.err (!%p546_p6)
}
  0x4c   :  { %s550_s26 = scalar_lea.vmem %s67_s1, 16  ;;  %s554_s2 = scalar_lea.vmem %s67_s1, 32 }
  0x4d   :  { %p551_p7 = scmp.ne.s32.totalorder %s67_s1, %s550_s26  ;;  %p555_p8 = scmp.lt.s32.totalorder %s67_s1, %s67_s1 }
  0x4e   :  { %p556_p9 = scmp.lt.s32.totalorder %s554_s2, %s550_s26 }
  0x50   :  { %p557_p10 = por %p556_p9, %p555_p8 }
  0x52   :  { %p558_p11 = pnand %p557_p10, %p551_p7 }
  0x54   :  { %561 = shalt.err (!%p558_p11)
}
  0x55   :  { %69 = dma.hbm_to_vmem [thread:$0]  %s726_s4, 16, %s67_s1, [#allocation9]  }
  0x56   :  { %584 = dma.done.wait [#allocation3], 128  }
  0x57   :  { %585 = vsyncadd [#allocation3], 4294967168 }
  0x58   :  { %586 = dma.done.wait [#allocation6], 1040  }
  0x59   :  { %587 = vsyncadd [#allocation6], 4294966256 }
  0x5a   :  { %588 = dma.done.wait [#allocation9], 1040  }
  0x5b   :  { %589 = vsyncadd [#allocation9], 4294966256  ;;  %v599_v0 = vmov 0.0   ;;  %vm600_vm0 = vmmov 0   ;;  %v431_v1 = vld [vmem:[#allocation5] sm:$0xff]   ;;  %v432_v2 = vld [vmem:[#allocation5 + $0x8] sm:$0xff]  }
  0x5c   :  { %379 = vmatprep.subr.bf16.mxu0 %v599_v0  ;;  %395 = vmatprep.mubr.msk.bf16.mxu0 %vm600_vm0, %v599_v0  ;;  %v433_v3 = vld [vmem:[#allocation5 + $0x10] sm:$0xff]   ;;  %v440_v4 = vld [vmem:[#allocation8] sm:$0xff]   ;;  %v434_v5 = vld [vmem:[#allocation5 + $0x18] sm:$0xff]   ;;  %s601_s4 = smov [#allocation11]  }
  0x5d   :  { %399 = vmatprep.subr.bf16.mxu1 %v599_v0  ;;  %415 = vmatprep.mubr.msk.bf16.mxu1 %vm600_vm0, %v599_v0  ;;  %v441_v6 = vld [vmem:[#allocation8 + $0x8] sm:$0xff]   ;;  %v435_v7 = vld [vmem:[#allocation5 + $0x20] sm:$0xff]   ;;  %v442_v8 = vld [vmem:[#allocation8 + $0x10] sm:$0xff]   ;;  %s328_s28 = sshll.u32 %s601_s4, 4  ;;  %s329_s28 = int_to_ptr.vmem [resolvable:$true] %s328_s28 }
  0x5e   :  { %380 = vmatpush3.bf16.msra.mxu0 %v431_v1  ;;  %400 = vmatpush3.bf16.msra.mxu1 %v440_v4  ;;  %v436_v9 = vld [vmem:[#allocation5 + $0x28] sm:$0xff]   ;;  %v443_v10 = vld [vmem:[#allocation8 + $0x18] sm:$0xff]   ;;  %v437_v11 = vld [vmem:[#allocation5 + $0x30] sm:$0xff]   ;;  %s562_s29 = scalar_lea.vmem %s329_s28, 256  ;;  %p567_p13 = scmp.lt.s32.totalorder %s329_s28, %s329_s28 }
  0x5f   :  { %381 = vmatprep.subr.bf16.mxu0 %v599_v0  ;;  %401 = vmatprep.subr.bf16.mxu1 %v599_v0  ;;  %v438_v12 = vld [vmem:[#allocation5 + $0x38] sm:$0xff]   ;;  %v444_v14 = vld [vmem:[#allocation8 + $0x20] sm:$0xff]   ;;  %v445_v15 = vld [vmem:[#allocation8 + $0x28] sm:$0xff]   ;;  %p563_p12 = scmp.ne.s32.totalorder %s329_s28, %s562_s29  ;;  %p568_p0 = scmp.lt.s32.totalorder %s562_s29, %s562_s29 }
  0x60   :  { %v439_v13 = vld [vmem:[#allocation2] sm:$0xff]   ;;  %v342_v18 = vld [vmem:[#allocation7] ss:$0 sm:$0xff]  ;;  %v352_v28 = vld [vmem:[#allocation10] ss:$0 sm:$0xff] }
  0x61   :  { %v446_v16 = vld [vmem:[#allocation8 + $0x30] sm:$0xff]   ;;  %v447_v17 = vld [vmem:[#allocation8 + $0x38] sm:$0xff]   ;;  %p569_p1 = por %p568_p0, %p567_p13 }
  0x62   :  { %382 = vmatpush3.bf16.msra.mxu0 %v432_v2  ;;  %402 = vmatpush3.bf16.msra.mxu1 %v441_v6 }
  0x63   :  { %383 = vmatprep.subr.bf16.mxu0 %v599_v0  ;;  %403 = vmatprep.subr.bf16.mxu1 %v599_v0  ;;  %p570_p2 = pnand %p569_p1, %p563_p12 }
  0x66   :  { %384 = vmatpush3.bf16.msra.mxu0 %v433_v3  ;;  %404 = vmatpush3.bf16.msra.mxu1 %v442_v8 }
  0x67   :  { %385 = vmatprep.subr.bf16.mxu0 %v599_v0  ;;  %405 = vmatprep.subr.bf16.mxu1 %v599_v0 }
  0x6a   :  { %386 = vmatpush3.bf16.msra.mxu0 %v434_v5  ;;  %406 = vmatpush3.bf16.msra.mxu1 %v443_v10 }
  0x6b   :  { %387 = vmatprep.subr.bf16.mxu0 %v599_v0  ;;  %407 = vmatprep.subr.bf16.mxu1 %v599_v0 }
  0x6e   :  { %388 = vmatpush3.bf16.msra.mxu0 %v435_v7  ;;  %408 = vmatpush3.bf16.msra.mxu1 %v444_v14 }
  0x6f   :  { %389 = vmatprep.subr.bf16.mxu0 %v599_v0  ;;  %409 = vmatprep.subr.bf16.mxu1 %v599_v0 }
  0x72   :  { %390 = vmatpush3.bf16.msra.mxu0 %v436_v9  ;;  %410 = vmatpush3.bf16.msra.mxu1 %v445_v15 }
  0x73   :  { %391 = vmatprep.subr.bf16.mxu0 %v599_v0  ;;  %411 = vmatprep.subr.bf16.mxu1 %v599_v0 }
  0x76   :  { %392 = vmatpush3.bf16.msra.mxu0 %v437_v11  ;;  %412 = vmatpush3.bf16.msra.mxu1 %v446_v16 }
  0x77   :  { %393 = vmatprep.subr.bf16.mxu0 %v599_v0  ;;  %413 = vmatprep.subr.bf16.mxu1 %v599_v0 }
  0x7a   :  { %394 = vmatpush3.bf16.msra.mxu0 %v438_v12  ;;  %414 = vmatpush3.bf16.msra.mxu1 %v447_v17 }
  0x7d   :  { %396 = vmatmul.mubr.bf16.vlgmr.msra.gmra.mrb[0].mxu0 %v439_v13 }
 0x150   :  { %v199_v19 = vpop.f32.mrb[0].mxu0 }
 0x151   :  { %v200_v20 = vadd.f32 %v342_v18, %v199_v19  ;;  %v397_v21 = vpop.f32.mrb[1].mxu0 }
 0x152   :  { %v202_v22 = vpop.f32.mrb[2].mxu0 }
 0x153   :  { %v203_v23 = vadd.f32 %v342_v18, %v202_v22  ;;  %v398_v24 = vpop.f32.mrb[3].mxu0  ;;  %448 = vtanh.f32 %v200_v20 }
 0x155   :  { %450 = vtanh.f32 %v203_v23 }
 0x15d   :  { %v449_v25 = vpop.eup %448 }
 0x15f   :  { %v451_v26 = vpop.eup %450 }
 0x160   :  { %v208_v27 = vpack.c.bf16 %v451_v26, %v449_v25 }
 0x162   :  { %416 = vmatmul.mubr.bf16.vlgmr.msra.gmra.mrb[0].mxu1 %v208_v27 }
 0x235   :  { %v314_v29 = vpop.f32.mrb[0].mxu1 }
 0x236   :  { %v315_v30 = vadd.f32 %v352_v28, %v314_v29  ;;  %v417_v31 = vpop.f32.mrb[1].mxu1 }
 0x237   :  { %v317_v32 = vpop.f32.mrb[2].mxu1 }
 0x238   :  { %321 = vst [vmem:[#allocation11] sm:$0xff] %v315_v30  ;;  %v318_v33 = vadd.f32 %v352_v28, %v317_v32  ;;  %v418_v34 = vpop.f32.mrb[3].mxu1 }
 0x23a   :  { %322 = vst [vmem:[#allocation11 + $0x8] sm:$0xff] %v318_v33 }
 0x23b   :  { %573 = shalt.err (!%p570_p2)
}
 0x23c   :  { %s574_s7 = scalar_lea.hbm %s727_s5, 256 }
 0x23d   :  { %p575_p3 = scmp.ne.s32.totalorder %s727_s5, %s574_s7  ;;  %p578_p4 = scmp.lt.u32.totalorder %s574_s7, %s727_s5 }
 0x23f   :  { %p580_p5 = pnand %p578_p4, %p575_p3 }
 0x241   :  { %583 = shalt.err (!%p580_p5)
}
 0x242   :  { %s602_s12 = smov 128   ;;  %s603_s13 = smov 8  }
 0x243   :  { %334 = dma.vmem_to_hbm [thread:$0]  %s329_s28, 256, %s727_s5, [#allocation4], %s602_s12, %s602_s12, %s603_s13  }
 0x244   :  { %590 = dma.done.wait [#allocation4], 256  }
 0x245   :  { %591 = vsyncadd [#allocation4], 4294967040 }
 0x246   :  { %338 = vsyncpa [#allocation3], 1 }
 0x247   :  { %339 = vsyncpa [#allocation6], 1 }
 0x248   :  { %340 = vsyncpa [#allocation9], 1 }
 0x249   :  { %341 = vsyncpa [#allocation4], 1 }

</bundles_post_ra>
